<compile_context>
chip_gen: v7x
topology: tpu7x:2x2x1
jax: 0.10.0
libtpu: 0.0.40
codegen_flags: <defaults>
</compile_context>

<pallas_src>
import jax
import jax.numpy as jnp
from jax.experimental import pallas as pl
from jax.experimental.pallas import tpu as pltpu  # noqa: F401  (TPU backend import)

B, IN, OUT = 2, 100, 100
# Lane/sublane-aligned padded shapes: sublane multiple of 8, lane multiple of 128.
PAD_M, PAD_K, PAD_N = 8, 128, 128


def linear_add_kernel(x_ref, wt_ref, other_ref, o_ref):
    # x_ref: (PAD_M, PAD_K), wt_ref: (PAD_K, PAD_N), other_ref: (1, PAD_N),
    # o_ref: (PAD_M, PAD_N).  Canonical contraction -> direct MXU matmul,
    # f32 accumulation; broadcast bias add rides a free VPU slot while the
    # MXU result FIFO drains, and the (8,128) output store is lane-dense.
    y = jnp.dot(x_ref[...], wt_ref[...], preferred_element_type=jnp.float32)
    o_ref[...] = y + other_ref[...]


def prepare_params(w, other):
    """One-time parameter prep: transpose W to (IN, OUT) and zero-pad to 128.

    Zero padding along IN (the contraction dim) contributes exactly 0 to every
    dot product, so the result is bit-exact; padded OUT columns are sliced off.
    """
    wt = w.T  # (IN, OUT), PyTorch stores Linear weight as (OUT, IN)
    wt_pad = jnp.zeros((PAD_K, PAD_N), jnp.float32).at[:IN, :OUT].set(wt)
    other_pad = jnp.zeros((1, PAD_N), jnp.float32).at[0, :OUT].set(other)
    return wt_pad, other_pad


@jax.jit
def model_forward(x, wt_pad, other_pad):
    b, k = x.shape
    # Pad activations: B -> 8 sublanes, IN -> 128 lanes (zeros, bit-exact).
    x_pad = jnp.zeros((PAD_M, PAD_K), jnp.float32).at[:b, :k].set(x)

    # Advisory cost hint for XLA's scheduler around the custom call; at this
    # size the wall clock is launch/pipeline-overhead bound, not compute bound.
    cost = pl.CostEstimate(
        flops=2 * PAD_M * PAD_K * PAD_N,
        bytes_accessed=4 * (PAD_M * PAD_K + PAD_K * PAD_N + PAD_N + PAD_M * PAD_N),
        transcendentals=0,
    )

    # NOTE: if these shapes ever scale (large B / K / OUT), switch to a tiled
    # grid with tm/tn/tk multiples of 128, bf16 MXU inputs (f32 accumulate,
    # f32 epilogue for v5e), "parallel" on independent grid axes for megacore,
    # and size tiles against 64 MiB VMEM on v7x (raise vmem_limit_bytes).
    out_pad = pl.pallas_call(
        linear_add_kernel,
        out_shape=jax.ShapeDtypeStruct((PAD_M, PAD_N), jnp.float32),
        grid=(),  # tiny operands; whole padded arrays fit in VMEM as one block
        in_specs=[
            pl.BlockSpec((PAD_M, PAD_K), lambda: (0, 0)),
            pl.BlockSpec((PAD_K, PAD_N), lambda: (0, 0)),
            pl.BlockSpec((1, PAD_N), lambda: (0, 0)),
        ],
        out_specs=pl.BlockSpec((PAD_M, PAD_N), lambda: (0, 0)),
        cost_estimate=cost,
    )(x_pad, wt_pad, other_pad)

    # Slice back to the logical (B, OUT) result.
    return out_pad[:b, :OUT]


if __name__ == "__main__":
    key = jax.random.PRNGKey(0)
    kx, kw = jax.random.split(key)

    # Deterministic inputs / parameters (synthetic, no checkpoint load).
    x1 = jax.random.normal(kx, (B, IN), dtype=jnp.float32)
    # nn.Linear default init is uniform(-1/sqrt(fan_in), 1/sqrt(fan_in)).
    bound = 1.0 / jnp.sqrt(jnp.float32(IN))
    w = jax.random.uniform(kw, (OUT, IN), dtype=jnp.float32,
                           minval=-bound, maxval=bound)
    other = jnp.ones((OUT,), dtype=jnp.float32)  # self.other = torch.ones((100,))

    # One-time parameter padding/transpose (outside the per-call path).
    wt_pad, other_pad = prepare_params(w, other)

    out = model_forward(x1, wt_pad, other_pad)
    out = jax.block_until_ready(out)

    # Correctness check against plain-JAX reference of the PyTorch forward.
    ref = x1 @ w.T + other
    assert out.shape == (B, OUT)
    assert jnp.allclose(out, ref, atol=1e-5, rtol=1e-5)

    print("KERNEL_OK")
</pallas_src>

<mosaic_0001>
module attributes {stable_mosaic.version = 11 : i64} {
  func.func @linear_add_kernel(%arg0: memref<8x128xf32, #tpu.memory_space<vmem>>, %arg1: memref<128x128xf32, #tpu.memory_space<vmem>>, %arg2: memref<1x128xf32, #tpu.memory_space<vmem>>, %arg3: memref<8x128xf32, #tpu.memory_space<vmem>>) attributes {dimension_semantics = [], scalar_prefetch = 0 : i64, scratch_operands = 0 : i64, tpu.core_type = #tpu.core_type<tc>} {
    %c0 = arith.constant 0 : index
    %c0_0 = arith.constant 0 : index
    %0 = vector.load %arg0[%c0, %c0_0] : memref<8x128xf32, #tpu.memory_space<vmem>>, vector<8x128xf32>
    %c0_1 = arith.constant 0 : index
    %c0_2 = arith.constant 0 : index
    %1 = vector.load %arg1[%c0_1, %c0_2] : memref<128x128xf32, #tpu.memory_space<vmem>>, vector<128x128xf32>
    %cst = arith.constant dense<0.000000e+00> : vector<8x128xf32>
    %2 = tpu.matmul %0, %1, %cst {dimension_numbers = #tpu.dot_dimension_numbers<[1], [0], [0], [1], [0, 0, 1, 1], [], []>} : vector<8x128xf32>, vector<128x128xf32>, vector<8x128xf32> -> vector<8x128xf32>
    %c0_3 = arith.constant 0 : index
    %c0_4 = arith.constant 0 : index
    %3 = vector.load %arg2[%c0_3, %c0_4] : memref<1x128xf32, #tpu.memory_space<vmem>>, vector<1x128xf32>
    %4 = vector.broadcast %3 : vector<1x128xf32> to vector<8x128xf32>
    %5 = arith.addf %2, %4 : vector<8x128xf32>
    %c0_5 = arith.constant 0 : index
    %c0_6 = arith.constant 0 : index
    %6 = vector.load %arg3[%c0_5, %c0_6] : memref<8x128xf32, #tpu.memory_space<vmem>>, vector<8x128xf32>
    tpu.vector_store %arg3[%c0_5, %c0_6], %5 {strides = array<i32>} : memref<8x128xf32, #tpu.memory_space<vmem>>, vector<8x128xf32>,
    return
  }
}

</mosaic_0001>

<bundles_post_ra>
// kernel: model_forward.1
= control target key start
LH: loop header
LB: loop body
LE: loop exit
PB: predicated region body
PF: predicated region fallthrough
CT: control target
= control target key end

     0   :  { %8 = vsyncpa [#allocation3], 0  ;;  %s235_s12 = smov [#allocation2]   ;;  %s282_s0 = inlined_call_operand.vmem [shape: f32[8,128], index: 0, kind: input, shape index: {}]   ;;  %s283_s1 = inlined_call_operand.hbm [shape: f32[128,128], index: 1, kind: input, shape index: {}]   ;;  %s284_s2 = inlined_call_operand.vmem [shape: f32[1,128], index: 2, kind: input, shape index: {}]   ;;  %s285_s3 = inlined_call_operand.vmem [shape: f32[8,128], index: 3, kind: output, shape index: {}]  }
   0x1   :  { %s16_s13 = sshll.u32 %s235_s12, 4  ;;  %s211_s16 = scalar_lea.hbm %s283_s1, 2048  ;;  %s17_s13 = int_to_ptr.vmem [resolvable:$true] %s16_s13 }
   0x2   :  { %p212_p0 = scmp.ne.s32.totalorder %s283_s1, %s211_s16  ;;  %p215_p1 = scmp.lt.u32.totalorder %s211_s16, %s283_s1 }
   0x4   :  { %p217_p2 = pnand %p215_p1, %p212_p0 }
   0x6   :  { %220 = shalt.err (!%p217_p2)
}
   0x7   :  { %s221_s21 = scalar_lea.vmem %s17_s13, 2048  ;;  %p226_p4 = scmp.lt.s32.totalorder %s17_s13, %s17_s13 }
   0x8   :  { %p222_p3 = scmp.ne.s32.totalorder %s17_s13, %s221_s21  ;;  %p227_p5 = scmp.lt.s32.totalorder %s221_s21, %s221_s21 }
   0xa   :  { %p228_p6 = por %p227_p5, %p226_p4 }
   0xc   :  { %p229_p7 = pnand %p228_p6, %p222_p3 }
   0xe   :  { %232 = shalt.err (!%p229_p7)
}
   0xf   :  { %s236_s22 = smov 128   ;;  %s237_s23 = smov 8  }
  0x10   :  { %22 = dma.hbm_to_vmem [thread:$0]  %s283_s1, 2048, %s17_s13, [#allocation3], %s236_s22, %s236_s22, %s237_s23  }
  0x11   :  { %233 = dma.done.wait [#allocation3], 2048  }
  0x12   :  { %234 = vsyncadd [#allocation3], 4294965248  ;;  %v238_v0 = vmov 0.0|0.0   ;;  %vm239_vm0 = vmmov 0   ;;  %v240_v1 = vmov 0.0   ;;  %v29_v2 = vld [vmem:[#allocation2] sm:$0xff] }
  0x13   :  { %181 = vmatprep.subr.bf16.mxu0 %v238_v0  ;;  %178 = vmatprep.mubr.msk.f32.mxu0 %vm239_vm0, %v240_v1  ;;  %v30_v3 = vld [vmem:[#allocation2 + $0x8] sm:$0xff]  ;;  %v31_v4 = vld [vmem:[#allocation2 + $0x10] sm:$0xff]  ;;  %v32_v6 = vld [vmem:[#allocation2 + $0x18] sm:$0xff] }
  0x14   :  { %v182_v5 = vpack.c.bf16 %v30_v3, %v29_v2  ;;  %v185_v7 = vpack.c.bf16 %v32_v6, %v31_v4  ;;  %v33_v8 = vld [vmem:[#allocation2 + $0x20] sm:$0xff]  ;;  %v34_v9 = vld [vmem:[#allocation2 + $0x28] sm:$0xff]  ;;  %v35_v11 = vld [vmem:[#allocation2 + $0x30] sm:$0xff] }
  0x15   :  { %v188_v10 = vpack.c.bf16 %v34_v9, %v33_v8  ;;  %v36_v12 = vld [vmem:[#allocation2 + $0x38] sm:$0xff]  ;;  %v37_v14 = vld [vmem:[#allocation2 + $0x40] sm:$0xff]  ;;  %v38_v15 = vld [vmem:[#allocation2 + $0x48] sm:$0xff] }
  0x16   :  { %183 = vmatpush3.bf16.msra.mxu0 %v182_v5  ;;  %v191_v13 = vpack.c.bf16 %v36_v12, %v35_v11  ;;  %v194_v16 = vpack.c.bf16 %v38_v15, %v37_v14  ;;  %v39_v17 = vld [vmem:[#allocation2 + $0x50] sm:$0xff]  ;;  %v40_v18 = vld [vmem:[#allocation2 + $0x58] sm:$0xff]  ;;  %v41_v20 = vld [vmem:[#allocation2 + $0x60] sm:$0xff] }
  0x17   :  { %184 = vmatprep.subr.bf16.mxu0 %v238_v0  ;;  %v197_v19 = vpack.c.bf16 %v40_v18, %v39_v17  ;;  %v42_v21 = vld [vmem:[#allocation2 + $0x68] sm:$0xff]  ;;  %v43_v23 = vld [vmem:[#allocation2 + $0x70] sm:$0xff]  ;;  %v44_v24 = vld [vmem:[#allocation2 + $0x78] sm:$0xff] }
  0x18   :  { %v200_v22 = vpack.c.bf16 %v42_v21, %v41_v20  ;;  %v203_v25 = vpack.c.bf16 %v44_v24, %v43_v23  ;;  %v28_v26 = vld [vmem:[%s282_s0] sm:$0xff] }
  0x19   :  { %v128_v27 = vld [vmem:[%s284_s2] ss:$0 sm:$0xff] }
  0x1a   :  { %186 = vmatpush3.bf16.msra.mxu0 %v185_v7 }
  0x1b   :  { %187 = vmatprep.subr.bf16.mxu0 %v238_v0 }
  0x1e   :  { %189 = vmatpush3.bf16.msra.mxu0 %v188_v10 }
  0x1f   :  { %190 = vmatprep.subr.bf16.mxu0 %v238_v0 }
  0x22   :  { %192 = vmatpush3.bf16.msra.mxu0 %v191_v13 }
  0x23   :  { %193 = vmatprep.subr.bf16.mxu0 %v238_v0 }
  0x26   :  { %195 = vmatpush3.bf16.msra.mxu0 %v194_v16 }
  0x27   :  { %196 = vmatprep.subr.bf16.mxu0 %v238_v0 }
  0x2a   :  { %198 = vmatpush3.bf16.msra.mxu0 %v197_v19 }
  0x2b   :  { %199 = vmatprep.subr.bf16.mxu0 %v238_v0 }
  0x2e   :  { %201 = vmatpush3.bf16.msra.mxu0 %v200_v22 }
  0x2f   :  { %202 = vmatprep.subr.bf16.mxu0 %v238_v0 }
  0x32   :  { %204 = vmatpush3.bf16.msra.mxu0 %v203_v25 }
  0x35   :  { %179 = vmatmul.mubr.f32.vlgmr.msra.gmra.mrb[0].mxu0 %v28_v26 }
 0x108   :  { %v118_v28 = vpop.f32.mrb[0].mxu0 }
 0x109   :  { %v119_v29 = vadd.f32 %v128_v27, %v118_v28  ;;  %v180_v30 = vpop.f32.mrb[1].mxu0 }
 0x10b   :  { %122 = vst [vmem:[%s285_s3] sm:$0xff] %v119_v29 }
 0x10c   :  { %127 = vsyncpa [#allocation3], 1 }

</bundles_post_ra>
